<compile_context>
chip_gen: v7x
topology: tpu7x:2x2x1
jax: 0.10.0
libtpu: 0.0.40
codegen_flags: <defaults>
</compile_context>

<pallas_src>
import jax
import jax.numpy as jnp
from jax.experimental import pallas as pl
from jax.experimental.pallas import tpu as pltpu


def _recover_kernel(x_ref, lr_ref, o_ref):
    # x_ref / o_ref : (TB, r, W*r)  -- TB low-res rows, each with its r hi-res rows
    # lr_ref        : (TB, 1, W*r)  -- low-res row, already expanded along W (lane-dense)
    x = x_ref[...]
    lr = lr_ref[...]
    # Nearest upsample along H == broadcast of the size-1 sublane dim; multiply on VPU.
    o_ref[...] = (x * lr).astype(o_ref.dtype)


def _round_up(v, m):
    return ((v + m - 1) // m) * m


def _choose_block_rows(nch, r, wr, itemsize, vmem_budget_bytes):
    """Pick how many low-res rows (TB) each grid step processes."""
    sub = 8 * max(1, 4 // itemsize)          # sublane quantum: f32 -> 8, bf16 -> 16
    lanep = _round_up(wr, 128)               # lane padding of the minor dim
    rpad = _round_up(max(r, 1), sub)         # sublane padding of the r axis
    # Padded VMEM per low-res row in a block: x + out (r padded) + lr (1 padded).
    per_row = (2 * rpad + sub) * lanep * itemsize
    tb = int(vmem_budget_bytes // (2 * per_row))   # 2x: double-buffered pipeline
    tb = max(sub, (tb // sub) * sub)
    if tb >= nch:
        if nch >= 2 * sub:
            # Keep at least two grid steps so v7x's two TensorCores both get work.
            tb = min(nch, _round_up(pl.cdiv(nch, 2), sub))
        else:
            tb = nch
    return tb


def recover_from_density(x, lr_img, upscale_factor, *,
                         vmem_budget_bytes=24 * 1024 * 1024):
    """x: (N, C, H*r, W*r), lr_img: (N, C, H, W)  ->  (N, C, H*r, W*r)"""
    r = int(upscale_factor)
    N, C, HR, WR = x.shape
    Nl, Cl, H, W = lr_img.shape
    assert (N, C) == (Nl, Cl) and HR == H * r and WR == W * r

    nch = N * C * H
    itemsize = jnp.dtype(x.dtype).itemsize

    # W-direction nearest upsample of the small low-res map (cheap, done by XLA);
    # the H-direction upsample is a free sublane broadcast inside the kernel.
    lr_wide = jnp.repeat(lr_img, r, axis=-1)          # (N, C, H, W*r)

    # Pure metadata reshapes: group each low-res row with its r hi-res rows.
    x_v = x.reshape(nch, r, WR)
    lr_v = lr_wide.reshape(nch, 1, WR)

    tb = _choose_block_rows(nch, r, WR, itemsize, vmem_budget_bytes)
    grid = (pl.cdiv(nch, tb),)

    cost = pl.CostEstimate(
        flops=int(x.size),
        transcendentals=0,
        bytes_accessed=int(2 * x.size * itemsize
                           + lr_v.size * jnp.dtype(lr_v.dtype).itemsize),
    )

    out_v = pl.pallas_call(
        _recover_kernel,
        out_shape=jax.ShapeDtypeStruct((nch, r, WR), x.dtype),
        grid=grid,
        in_specs=[
            pl.BlockSpec((tb, r, WR), lambda i: (i, 0, 0)),
            pl.BlockSpec((tb, 1, WR), lambda i: (i, 0, 0)),
        ],
        out_specs=pl.BlockSpec((tb, r, WR), lambda i: (i, 0, 0)),
        compiler_params=pltpu.CompilerParams(
            dimension_semantics=("parallel",),
            vmem_limit_bytes=48 * 1024 * 1024,
        ),
        cost_estimate=cost,
    )(x_v, lr_v)

    return out_v.reshape(N, C, HR, WR)


def _reference(x, lr_img, r):
    # pure-JAX reference of nn.Upsample(mode='nearest') followed by multiply
    up = jnp.repeat(jnp.repeat(lr_img, r, axis=2), r, axis=3)
    return x * up


if __name__ == "__main__":
    key = jax.random.PRNGKey(0)

    cases = [
        # (N, C, H, W, r)
        (2, 4, 8, 8, 2),      # x: (2, 4, 16, 16)   -- small sanity case
        (1, 3, 64, 96, 4),    # x: (1, 3, 256, 384) -- lane-dense (384 = 3*128), 2 grid steps
    ]

    for idx, (N, C, H, W, r) in enumerate(cases):
        k1, k2 = jax.random.split(jax.random.fold_in(key, idx))
        x = jax.random.normal(k1, (N, C, H * r, W * r), dtype=jnp.float32)
        lr_img = jax.random.normal(k2, (N, C, H, W), dtype=jnp.float32)

        out = jax.block_until_ready(recover_from_density(x, lr_img, r))
        ref = _reference(x, lr_img, r)

        assert out.shape == ref.shape == (N, C, H * r, W * r)
        assert jnp.allclose(out, ref, atol=1e-6, rtol=1e-6), f"mismatch in case {idx}"

    print("KERNEL_OK")
</pallas_src>

<mosaic_0001>
module attributes {stable_mosaic.version = 11 : i64} {
  func.func @_recover_kernel(%arg0: i32, %arg1: memref<32x2x16xf32, #tpu.memory_space<vmem>>, %arg2: memref<32x1x16xf32, #tpu.memory_space<vmem>>, %arg3: memref<32x2x16xf32, #tpu.memory_space<vmem>>) attributes {dimension_semantics = [#tpu.dimension_semantics<parallel>], iteration_bounds = array<i64: 2>, scalar_prefetch = 0 : i64, scratch_operands = 0 : i64, tpu.core_type = #tpu.core_type<tc>, window_params = [{transform_indices = @transform_0, window_bounds = array<i64: 32, 2, 16>}, {transform_indices = @transform_1, window_bounds = array<i64: 32, 1, 16>}, {transform_indices = @transform_2, window_bounds = array<i64: 32, 2, 16>}]} {
    %c0 = arith.constant 0 : index
    %c0_0 = arith.constant 0 : index
    %c0_1 = arith.constant 0 : index
    %0 = vector.load %arg1[%c0, %c0_0, %c0_1] : memref<32x2x16xf32, #tpu.memory_space<vmem>>, vector<32x2x16xf32>
    %c0_2 = arith.constant 0 : index
    %c0_3 = arith.constant 0 : index
    %c0_4 = arith.constant 0 : index
    %1 = vector.load %arg2[%c0_2, %c0_3, %c0_4] : memref<32x1x16xf32, #tpu.memory_space<vmem>>, vector<32x1x16xf32>
    %2 = vector.broadcast %1 : vector<32x1x16xf32> to vector<32x2x16xf32>
    %3 = arith.mulf %0, %2 : vector<32x2x16xf32>
    %c0_5 = arith.constant 0 : index
    %c0_6 = arith.constant 0 : index
    %c0_7 = arith.constant 0 : index
    %4 = vector.load %arg3[%c0_5, %c0_6, %c0_7] : memref<32x2x16xf32, #tpu.memory_space<vmem>>, vector<32x2x16xf32>
    tpu.vector_store %arg3[%c0_5, %c0_6, %c0_7], %3 {strides = array<i32>} : memref<32x2x16xf32, #tpu.memory_space<vmem>>, vector<32x2x16xf32>,
    return
  }
  func.func @transform_0(%arg0: i32) -> (i32, i32, i32) {
    %c0_i32 = arith.constant 0 : i32
    %c0_i32_0 = arith.constant 0 : i32
    %c0_i32_1 = arith.constant 0 : i32
    return %arg0, %c0_i32, %c0_i32_0 : i32, i32, i32
  }
  func.func @transform_1(%arg0: i32) -> (i32, i32, i32) {
    %c0_i32 = arith.constant 0 : i32
    %c0_i32_0 = arith.constant 0 : i32
    %c0_i32_1 = arith.constant 0 : i32
    return %arg0, %c0_i32, %c0_i32_0 : i32, i32, i32
  }
  func.func @transform_2(%arg0: i32) -> (i32, i32, i32) {
    %c0_i32 = arith.constant 0 : i32
    %c0_i32_0 = arith.constant 0 : i32
    %c0_i32_1 = arith.constant 0 : i32
    return %arg0, %c0_i32, %c0_i32_0 : i32, i32, i32
  }
}

</mosaic_0001>

<bundles_post_ra>
// kernel: tpu_custom_call.1
= control target key start
LH: loop header
LB: loop body
LE: loop exit
PB: predicated region body
PF: predicated region fallthrough
CT: control target
= control target key end

     0   :  { %s627_s9 = smov 0   ;;  %s781_s0 = inlined_call_operand.vmem [shape: f32[64,2,16], index: 0, kind: input, shape index: {}]   ;;  %s782_s1 = inlined_call_operand.vmem [shape: f32[64,1,16], index: 1, kind: input, shape index: {}]   ;;  %s783_s2 = inlined_call_operand.vmem [shape: f32[64,2,16], index: 2, kind: output, shape index: {}]  }
   0x1 LB: > { %s552_s10 = sadd.s32 4294967295, %s610_s9   ;;  %p556_p0 = scmp.ge.s32.totalorder %s610_s9, 1  ;;  %s610_s9 = sphi %s627_s9, %s12_s9  }
   0x2   : > { %p123_p1 = scmp.lt.s32.totalorder %s610_s9, 3 }
   0x4   : > { %p124_p2 = pnand %p556_p0, %p123_p1 }
   0x5   : > { %s557_s11 = sshll.u32 (!%p124_p2), %s552_s10, 5  ;;  %vm454_vm0 = vcmask (!%p124_p2), 123904  }
   0x6   : > { %127 = sbr.rel (%p124_p2) target bundleno = 50 (0x32), region = 28  ;;  %p150_p3 = scmp.lt.s32.totalorder (!%p124_p2), %s557_s11, 63 }
   0xd   : > { %s785_s11 = smov (!%p150_p3, %s557_s11), 63 }
   0xe   : > { %s558_s12 = sshll.u32 %s785_s11, 1  ;;  %s638_s15 = scalar_lea.vmem %s782_s1, %s785_s11 }
   0xf   : > { %s643_s18 = scalar_lea.vmem %s781_s0, %s558_s12  ;;  %v562_v0 = vld [vmem:[%s638_s15] ss:$0 sm:$0xff]  ;;  %v563_v1 = vld [vmem:[%s638_s15 + $0x1] ss:$0 sm:$0xff]  ;;  %v564_v2 = vld [vmem:[%s638_s15 + $0x2] ss:$0 sm:$0xff]  ;;  %s651_s21 = scalar_lea.vmem %s783_s2, %s558_s12 }
  0x10   : > { %v166_v3 = vld [vmem:[%s643_s18] sm:$0x3]  ;;  %v167_v4 = vld [vmem:[%s643_s18 + $0x2] sm:$0x3]  ;;  %v168_v5 = vld [vmem:[%s643_s18 + $0x4] sm:$0x3] }
  0x11   : > { %v422_v6 = vmul.f32 %v562_v0, %v166_v3  ;;  %v423_v7 = vmul.f32 %v563_v1, %v167_v4  ;;  %v424_v8 = vmul.f32 %v564_v2, %v168_v5  ;;  %v169_v9 = vld [vmem:[%s643_s18 + $0x6] sm:$0x3]  ;;  %v565_v10 = vld [vmem:[%s638_s15 + $0x3] ss:$0 sm:$0xff]  ;;  %v170_v11 = vld [vmem:[%s643_s18 + $0x8] sm:$0x3] }
  0x12   : > { %v425_v12 = vmul.f32 %v565_v10, %v169_v9  ;;  %v566_v13 = vld [vmem:[%s638_s15 + $0x4] ss:$0 sm:$0xff]  ;;  %v171_v14 = vld [vmem:[%s643_s18 + $0xa] sm:$0x3]  ;;  %v567_v15 = vld [vmem:[%s638_s15 + $0x5] ss:$0 sm:$0xff] }
  0x13   : > { %455 = vst.msk [vmem:[%s651_s21] sm:$0x3] %vm454_vm0, %v422_v6  ;;  %456 = vst.msk [vmem:[%s651_s21 + $0x2] sm:$0x3] %vm454_vm0, %v423_v7  ;;  %v426_v16 = vmul.f32 %v566_v13, %v170_v11  ;;  %v427_v17 = vmul.f32 %v567_v15, %v171_v14  ;;  %v172_v18 = vld [vmem:[%s643_s18 + $0xc] sm:$0x3] }
  0x14   : > { %457 = vst.msk [vmem:[%s651_s21 + $0x4] sm:$0x3] %vm454_vm0, %v424_v8  ;;  %v568_v19 = vld [vmem:[%s638_s15 + $0x6] ss:$0 sm:$0xff]  ;;  %v173_v20 = vld [vmem:[%s643_s18 + $0xe] sm:$0x3] }
  0x15   : > { %458 = vst.msk [vmem:[%s651_s21 + $0x6] sm:$0x3] %vm454_vm0, %v425_v12  ;;  %v428_v21 = vmul.f32 %v568_v19, %v172_v18  ;;  %v569_v22 = vld [vmem:[%s638_s15 + $0x7] ss:$0 sm:$0xff]  ;;  %v174_v23 = vld [vmem:[%s643_s18 + $0x10] sm:$0x3] }
  0x16   : > { %v570_v24 = vld [vmem:[%s638_s15 + $0x8] ss:$0 sm:$0xff]  ;;  %459 = vst.msk [vmem:[%s651_s21 + $0x8] sm:$0x3] %vm454_vm0, %v426_v16  ;;  %460 = vst.msk [vmem:[%s651_s21 + $0xa] sm:$0x3] %vm454_vm0, %v427_v17  ;;  %v429_v25 = vmul.f32 %v569_v22, %v173_v20 }
  0x17   : > { %v430_v26 = vmul.f32 %v570_v24, %v174_v23  ;;  %v175_v27 = vld [vmem:[%s643_s18 + $0x12] sm:$0x3]  ;;  %v571_v28 = vld [vmem:[%s638_s15 + $0x9] ss:$0 sm:$0xff]  ;;  %v176_v29 = vld [vmem:[%s643_s18 + $0x14] sm:$0x3] }
  0x18   : > { %461 = vst.msk [vmem:[%s651_s21 + $0xc] sm:$0x3] %vm454_vm0, %v428_v21  ;;  %v431_v30 = vmul.f32 %v571_v28, %v175_v27  ;;  %v572_v31 = vld [vmem:[%s638_s15 + $0xa] ss:$0 sm:$0xff]  ;;  %v177_v32 = vld [vmem:[%s643_s18 + $0x16] sm:$0x3] }
  0x19   : > { %v573_v33 = vld [vmem:[%s638_s15 + $0xb] ss:$0 sm:$0xff]  ;;  %462 = vst.msk [vmem:[%s651_s21 + $0xe] sm:$0x3] %vm454_vm0, %v429_v25  ;;  %463 = vst.msk [vmem:[%s651_s21 + $0x10] sm:$0x3] %vm454_vm0, %v430_v26  ;;  %v432_v34 = vmul.f32 %v572_v31, %v176_v29 }
  0x1a   : > { %v433_v35 = vmul.f32 %v573_v33, %v177_v32  ;;  %v178_v36 = vld [vmem:[%s643_s18 + $0x18] sm:$0x3]  ;;  %v574_v37 = vld [vmem:[%s638_s15 + $0xc] ss:$0 sm:$0xff]  ;;  %v179_v38 = vld [vmem:[%s643_s18 + $0x1a] sm:$0x3] }
  0x1b   : > { %464 = vst.msk [vmem:[%s651_s21 + $0x12] sm:$0x3] %vm454_vm0, %v431_v30  ;;  %v434_v39 = vmul.f32 %v574_v37, %v178_v36  ;;  %v575_v40 = vld [vmem:[%s638_s15 + $0xd] ss:$0 sm:$0xff]  ;;  %v180_v41 = vld [vmem:[%s643_s18 + $0x1c] sm:$0x3] }
  0x1c   : > { %v576_v42 = vld [vmem:[%s638_s15 + $0xe] ss:$0 sm:$0xff]  ;;  %465 = vst.msk [vmem:[%s651_s21 + $0x14] sm:$0x3] %vm454_vm0, %v432_v34  ;;  %466 = vst.msk [vmem:[%s651_s21 + $0x16] sm:$0x3] %vm454_vm0, %v433_v35  ;;  %v435_v43 = vmul.f32 %v575_v40, %v179_v38 }
  0x1d   : > { %v436_v44 = vmul.f32 %v576_v42, %v180_v41  ;;  %v181_v45 = vld [vmem:[%s643_s18 + $0x1e] sm:$0x3]  ;;  %v577_v46 = vld [vmem:[%s638_s15 + $0xf] ss:$0 sm:$0xff]  ;;  %v182_v47 = vld [vmem:[%s643_s18 + $0x20] sm:$0x3] }
  0x1e   : > { %467 = vst.msk [vmem:[%s651_s21 + $0x18] sm:$0x3] %vm454_vm0, %v434_v39  ;;  %v437_v48 = vmul.f32 %v577_v46, %v181_v45  ;;  %v578_v49 = vld [vmem:[%s638_s15 + $0x10] ss:$0 sm:$0xff]  ;;  %v183_v50 = vld [vmem:[%s643_s18 + $0x22] sm:$0x3] }
  0x1f   : > { %v579_v51 = vld [vmem:[%s638_s15 + $0x11] ss:$0 sm:$0xff]  ;;  %468 = vst.msk [vmem:[%s651_s21 + $0x1a] sm:$0x3] %vm454_vm0, %v435_v43  ;;  %469 = vst.msk [vmem:[%s651_s21 + $0x1c] sm:$0x3] %vm454_vm0, %v436_v44  ;;  %v438_v52 = vmul.f32 %v578_v49, %v182_v47 }
  0x20   : > { %v439_v53 = vmul.f32 %v579_v51, %v183_v50  ;;  %v184_v54 = vld [vmem:[%s643_s18 + $0x24] sm:$0x3]  ;;  %v580_v55 = vld [vmem:[%s638_s15 + $0x12] ss:$0 sm:$0xff]  ;;  %v185_v56 = vld [vmem:[%s643_s18 + $0x26] sm:$0x3] }
  0x21   : > { %470 = vst.msk [vmem:[%s651_s21 + $0x1e] sm:$0x3] %vm454_vm0, %v437_v48  ;;  %v440_v57 = vmul.f32 %v580_v55, %v184_v54  ;;  %v581_v58 = vld [vmem:[%s638_s15 + $0x13] ss:$0 sm:$0xff]  ;;  %v186_v59 = vld [vmem:[%s643_s18 + $0x28] sm:$0x3] }
  0x22   : > { %v582_v60 = vld [vmem:[%s638_s15 + $0x14] ss:$0 sm:$0xff]  ;;  %471 = vst.msk [vmem:[%s651_s21 + $0x20] sm:$0x3] %vm454_vm0, %v438_v52  ;;  %472 = vst.msk [vmem:[%s651_s21 + $0x22] sm:$0x3] %vm454_vm0, %v439_v53  ;;  %v441_v61 = vmul.f32 %v581_v58, %v185_v56 }
  0x23   : > { %v442_v62 = vmul.f32 %v582_v60, %v186_v59  ;;  %v187_v63 = vld [vmem:[%s643_s18 + $0x2a] sm:$0x3]  ;;  %v583_v0 = vld [vmem:[%s638_s15 + $0x15] ss:$0 sm:$0xff]  ;;  %v188_v1 = vld [vmem:[%s643_s18 + $0x2c] sm:$0x3] }
  0x24   : > { %473 = vst.msk [vmem:[%s651_s21 + $0x24] sm:$0x3] %vm454_vm0, %v440_v57  ;;  %v443_v2 = vmul.f32 %v583_v0, %v187_v63  ;;  %v584_v3 = vld [vmem:[%s638_s15 + $0x16] ss:$0 sm:$0xff]  ;;  %v189_v4 = vld [vmem:[%s643_s18 + $0x2e] sm:$0x3] }
  0x25   : > { %v585_v5 = vld [vmem:[%s638_s15 + $0x17] ss:$0 sm:$0xff]  ;;  %474 = vst.msk [vmem:[%s651_s21 + $0x26] sm:$0x3] %vm454_vm0, %v441_v61  ;;  %475 = vst.msk [vmem:[%s651_s21 + $0x28] sm:$0x3] %vm454_vm0, %v442_v62  ;;  %v444_v6 = vmul.f32 %v584_v3, %v188_v1 }
  0x26   : > { %v445_v7 = vmul.f32 %v585_v5, %v189_v4  ;;  %v190_v8 = vld [vmem:[%s643_s18 + $0x30] sm:$0x3]  ;;  %v586_v9 = vld [vmem:[%s638_s15 + $0x18] ss:$0 sm:$0xff]  ;;  %v191_v10 = vld [vmem:[%s643_s18 + $0x32] sm:$0x3] }
  0x27   : > { %476 = vst.msk [vmem:[%s651_s21 + $0x2a] sm:$0x3] %vm454_vm0, %v443_v2  ;;  %v446_v11 = vmul.f32 %v586_v9, %v190_v8  ;;  %v587_v12 = vld [vmem:[%s638_s15 + $0x19] ss:$0 sm:$0xff]  ;;  %v192_v13 = vld [vmem:[%s643_s18 + $0x34] sm:$0x3] }
  0x28   : > { %v588_v14 = vld [vmem:[%s638_s15 + $0x1a] ss:$0 sm:$0xff]  ;;  %477 = vst.msk [vmem:[%s651_s21 + $0x2c] sm:$0x3] %vm454_vm0, %v444_v6  ;;  %478 = vst.msk [vmem:[%s651_s21 + $0x2e] sm:$0x3] %vm454_vm0, %v445_v7  ;;  %v447_v15 = vmul.f32 %v587_v12, %v191_v10 }
  0x29   : > { %v448_v16 = vmul.f32 %v588_v14, %v192_v13  ;;  %v193_v17 = vld [vmem:[%s643_s18 + $0x36] sm:$0x3]  ;;  %v589_v18 = vld [vmem:[%s638_s15 + $0x1b] ss:$0 sm:$0xff]  ;;  %v194_v19 = vld [vmem:[%s643_s18 + $0x38] sm:$0x3] }
  0x2a   : > { %479 = vst.msk [vmem:[%s651_s21 + $0x30] sm:$0x3] %vm454_vm0, %v446_v11  ;;  %v449_v20 = vmul.f32 %v589_v18, %v193_v17  ;;  %v590_v21 = vld [vmem:[%s638_s15 + $0x1c] ss:$0 sm:$0xff]  ;;  %v195_v22 = vld [vmem:[%s643_s18 + $0x3a] sm:$0x3] }
  0x2b   : > { %v591_v23 = vld [vmem:[%s638_s15 + $0x1d] ss:$0 sm:$0xff]  ;;  %480 = vst.msk [vmem:[%s651_s21 + $0x32] sm:$0x3] %vm454_vm0, %v447_v15  ;;  %481 = vst.msk [vmem:[%s651_s21 + $0x34] sm:$0x3] %vm454_vm0, %v448_v16  ;;  %v450_v24 = vmul.f32 %v590_v21, %v194_v19 }
  0x2c   : > { %v451_v25 = vmul.f32 %v591_v23, %v195_v22  ;;  %v196_v26 = vld [vmem:[%s643_s18 + $0x3c] sm:$0x3]  ;;  %v592_v27 = vld [vmem:[%s638_s15 + $0x1e] ss:$0 sm:$0xff]  ;;  %482 = vst.msk [vmem:[%s651_s21 + $0x36] sm:$0x3] %vm454_vm0, %v449_v20 }
  0x2d   : > { %v197_v28 = vld [vmem:[%s643_s18 + $0x3e] sm:$0x3]  ;;  %v452_v29 = vmul.f32 %v592_v27, %v196_v26  ;;  %483 = vst.msk [vmem:[%s651_s21 + $0x38] sm:$0x3] %vm454_vm0, %v450_v24 }
  0x2e   : > { %v593_v30 = vld [vmem:[%s638_s15 + $0x1f] ss:$0 sm:$0xff]  ;;  %484 = vst.msk [vmem:[%s651_s21 + $0x3a] sm:$0x3] %vm454_vm0, %v451_v25 }
  0x2f   : > { %v453_v31 = vmul.f32 %v593_v30, %v197_v28  ;;  %485 = vst.msk [vmem:[%s651_s21 + $0x3c] sm:$0x3] %vm454_vm0, %v452_v29 }
  0x31   : > { %486 = vst.msk [vmem:[%s651_s21 + $0x3e] sm:$0x3] %vm454_vm0, %v453_v31 }
  0x32 PF: > { %s12_s9 = sadd.s32 1, %s610_s9  }
  0x33   : > { %p9_p4 = scmp.ge.s32.totalorder %s12_s9, 4  }
  0x35   :  { %11 = sbr.rel (!%p9_p4) target bundleno = 1 (0x1), region = 61 }

</bundles_post_ra>
